<compile_context>
chip_gen: v6e
topology: v6e:2x2x1
jax: 0.10.0
libtpu: 0.0.40
codegen_flags: <defaults>
</compile_context>

<pallas_src>
import math

import jax
import jax.numpy as jnp
from jax.experimental import pallas as pl
from jax.experimental.pallas import tpu as pltpu


def _round_up(a, b):
    return -(-a // b) * b


def _next_pow2(n):
    return 1 << max(0, (int(n) - 1).bit_length())


def _sublane_multiple(dtype):
    # f32 -> 8 rows per vreg, bf16/f16 -> 16, 8-bit -> 32
    return max(8, 32 // jnp.dtype(dtype).itemsize)


def node_embedding_kernel(x_ref, w_ref, b_ref, o_ref):
    # x_ref: (tm_p, pin)   w_ref: (pin, pout)   b_ref: (1, pout) f32
    # o_ref: (tm_p, pout)
    y = jnp.dot(x_ref[...], w_ref[...], preferred_element_type=jnp.float32)
    y = y + b_ref[...]                               # f32 epilogue (v5e-safe)
    # LeakyReLU, slope 0.01: max(y, 0.01*y) == where(y >= 0, y, 0.01*y)
    o_ref[...] = jnp.maximum(y, 0.01 * y).astype(o_ref.dtype)


def node_embedding(node_feats, w1, b1, w2, b2, *, tm_packed=2048, out_dtype=None):
    """node_feats: (N, in_feats); w1: (embd_dim, in_feats); b1: (embd_dim,);
    w2: (hid_units, embd_dim); b2: (hid_units,).

    tm_packed: row tile in *packed* rows (each packed row holds P nodes).
    out_dtype: output element type (default: node_feats.dtype).  Accumulation
               and the activation stay in f32; only the store casts.
    """
    N, in_feats = node_feats.shape
    hid_units = w2.shape[0]
    out_dtype = jnp.dtype(node_feats.dtype if out_dtype is None else out_dtype)

    # MXU operand dtype follows the input so there is no standalone HBM cast
    # pass: bf16 inputs run the bf16 MXU path, everything else runs f32.
    mm_dtype = jnp.dtype(jnp.bfloat16) if node_feats.dtype == jnp.bfloat16 \
        else jnp.dtype(jnp.float32)

    # ---- one-time algebraic fusion of the two Linears (outside the kernel) --
    w_fused = w1.T.astype(jnp.float32) @ w2.T.astype(jnp.float32)   # (in, hid)
    b_fused = (b1.astype(jnp.float32) @ w2.T.astype(jnp.float32)
               + b2.astype(jnp.float32))                            # (hid,)

    # ---- lane-dense packing geometry ----------------------------------------
    if in_feats <= 128:
        in_p = _next_pow2(in_feats)              # a divisor of 128
    else:
        in_p = _round_up(in_feats, 128)
    P = max(1, 128 // in_p)                      # nodes packed per row
    hid_p = _round_up(hid_units, 128 // P)       # makes P*hid_p a multiple of 128
    pin, pout = P * in_p, P * hid_p              # pin == 128 when in_feats <= 128

    # Pad fused weight/bias (zero rows/cols -> exact), then block-diag replicate.
    w_pad = jnp.zeros((in_p, hid_p), jnp.float32).at[:in_feats, :hid_units].set(w_fused)
    b_pad = jnp.zeros((hid_p,), jnp.float32).at[:hid_units].set(b_fused)
    w_mat = jnp.kron(jnp.eye(P, dtype=jnp.float32), w_pad).astype(mm_dtype)  # (pin, pout)
    b_mat = jnp.tile(b_pad, P).reshape(1, pout)                              # f32

    # ---- rows: pad only to a multiple of P (free reshape when N % P == 0) ---
    np_rows = -(-N // P)                         # packed rows produced
    n_pack = np_rows * P
    x = node_feats
    if x.dtype != mm_dtype:                      # no-op for f32 / bf16 inputs
        x = x.astype(mm_dtype)
    if n_pack != N or in_p != in_feats:
        x = jnp.pad(x, ((0, n_pack - N), (0, in_p - in_feats)))
    x_packed = x.reshape(np_rows, pin)           # contiguous -> free reshape

    # ---- tiling; ragged last tile handled by Pallas OOB-write masking -------
    sub = max(_sublane_multiple(mm_dtype), _sublane_multiple(out_dtype))
    tm_p = min(int(tm_packed), _round_up(np_rows, sub))
    tm_p = max(sub, _round_up(tm_p, sub))
    grid = (pl.cdiv(np_rows, tm_p),)

    itm, ito = mm_dtype.itemsize, out_dtype.itemsize
    vmem_need = 2 * tm_p * (pin * itm + pout * ito) + 2 * (pin * pout * itm + 4 * pout)
    vmem_limit = int(min(48 * 2**20, max(24 * 2**20, 2 * vmem_need)))

    cost = pl.CostEstimate(
        flops=2 * np_rows * pin * pout,
        transcendentals=0,
        bytes_accessed=(np_rows * pin * itm + np_rows * pout * ito
                        + pin * pout * itm + 4 * pout),
    )

    out_packed = pl.pallas_call(
        node_embedding_kernel,
        out_shape=jax.ShapeDtypeStruct((np_rows, pout), out_dtype),
        grid_spec=pltpu.PrefetchScalarGridSpec(
            num_scalar_prefetch=0,
            grid=grid,
            in_specs=[
                pl.BlockSpec((tm_p, pin), lambda i: (i, 0)),   # x tile (lane-dense)
                pl.BlockSpec((pin, pout), lambda i: (0, 0)),   # block-diag fused W
                pl.BlockSpec((1, pout), lambda i: (0, 0)),     # fused bias (f32)
            ],
            out_specs=pl.BlockSpec((tm_p, pout), lambda i: (i, 0)),
        ),
        compiler_params=pltpu.CompilerParams(
            dimension_semantics=("parallel",),   # v7x: shard rows across 2 TCs
            vmem_limit_bytes=vmem_limit,
        ),
        cost_estimate=cost,
    )(x_packed, w_mat, b_mat)

    # Unpack (np_rows, P*hid_p) -> (np_rows*P, hid_p); slice only if padded.
    out = out_packed.reshape(n_pack, hid_p)
    if n_pack != N or hid_p != hid_units:
        out = out[:N, :hid_units]
    return out


def reference(node_feats, w1, b1, w2, b2):
    h = node_feats @ w1.T + b1
    y = h @ w2.T + b2
    return jnp.where(y >= 0, y, 0.01 * y)


def _make_params(key, in_feats, embd_dim, hid_units):
    k_w1, k_b1, k_w2, k_b2 = jax.random.split(key, 4)
    xav = math.sqrt(6.0 / (in_feats + embd_dim))        # xavier_uniform_ (reset())
    w1 = jax.random.uniform(k_w1, (embd_dim, in_feats), jnp.float32, -xav, xav)
    b1 = jax.random.uniform(k_b1, (embd_dim,), jnp.float32,
                            -1.0 / math.sqrt(in_feats), 1.0 / math.sqrt(in_feats))
    kai = 1.0 / math.sqrt(embd_dim)                     # PyTorch default Linear init
    w2 = jax.random.uniform(k_w2, (hid_units, embd_dim), jnp.float32, -kai, kai)
    b2 = jax.random.uniform(k_b2, (hid_units,), jnp.float32, -kai, kai)
    return w1, b1, w2, b2


if __name__ == "__main__":
    N, in_feats, embd_dim, hid_units = 256, 16, 64, 32

    key = jax.random.PRNGKey(0)
    k_x, k_p, k_xb, k_pb = jax.random.split(key, 4)
    node_feats = jax.random.normal(k_x, (N, in_feats), dtype=jnp.float32)
    w1, b1, w2, b2 = _make_params(k_p, in_feats, embd_dim, hid_units)
    ref = reference(node_feats, w1, b1, w2, b2)

    # 1) default f32 path: N % P == 0 -> no pad, no output slice, single tile.
    out = jax.block_until_ready(node_embedding(node_feats, w1, b1, w2, b2))
    assert out.shape == (N, hid_units)
    assert jnp.allclose(out, ref, atol=1e-4, rtol=1e-4), "mismatch vs reference"

    # 2) non-divisible N + small tile -> row pad to multiple of P, multi-step
    #    grid with a ragged last tile (exercises Pallas OOB-write masking).
    N_odd = 250
    out_odd = jax.block_until_ready(
        node_embedding(node_feats[:N_odd], w1, b1, w2, b2, tm_packed=24))
    assert out_odd.shape == (N_odd, hid_units)
    assert jnp.allclose(out_odd, ref[:N_odd], atol=1e-4, rtol=1e-4), \
        "mismatch vs reference (ragged-tile path)"

    # 3) bf16 producer -> bf16 matmul operands + bf16 output (f32 accumulate).
    x_bf16 = node_feats.astype(jnp.bfloat16)
    out_bf16 = jax.block_until_ready(node_embedding(x_bf16, w1, b1, w2, b2))
    assert out_bf16.shape == (N, hid_units) and out_bf16.dtype == jnp.bfloat16
    ref_bf16 = reference(x_bf16.astype(jnp.float32), w1, b1, w2, b2)
    assert jnp.allclose(out_bf16.astype(jnp.float32), ref_bf16,
                        atol=5e-2, rtol=5e-2), "mismatch vs reference (bf16 path)"

    # 4) in_feats that does not divide 128 and a narrow hid -> generic
    #    lane-dense fallback (feature/hid padding, column slice at the end).
    N_b, in_b, embd_b, hid_b = 100, 48, 64, 20
    x_b = jax.random.normal(k_xb, (N_b, in_b), dtype=jnp.float32)
    w1b, b1b, w2b, b2b = _make_params(k_pb, in_b, embd_b, hid_b)
    out_b = jax.block_until_ready(node_embedding(x_b, w1b, b1b, w2b, b2b))
    assert out_b.shape == (N_b, hid_b)
    assert jnp.allclose(out_b, reference(x_b, w1b, b1b, w2b, b2b),
                        atol=1e-4, rtol=1e-4), "mismatch vs reference (generic path)"

    print("KERNEL_OK")
</pallas_src>

<mosaic_0001>
module attributes {stable_mosaic.version = 11 : i64} {
  func.func @node_embedding_kernel(%arg0: i32, %arg1: memref<32x128xf32, #tpu.memory_space<vmem>>, %arg2: memref<128x256xf32, #tpu.memory_space<vmem>>, %arg3: memref<1x256xf32, #tpu.memory_space<vmem>>, %arg4: memref<32x256xf32, #tpu.memory_space<vmem>>) attributes {dimension_semantics = [#tpu.dimension_semantics<parallel>], iteration_bounds = array<i64: 1>, scalar_prefetch = 0 : i64, scratch_operands = 0 : i64, tpu.core_type = #tpu.core_type<tc>, window_params = [{transform_indices = @transform_0, window_bounds = array<i64: 32, 128>}, {pipeline_mode = #tpu.pipeline_mode<synchronous>, transform_indices = @transform_1, window_bounds = array<i64: 128, 256>}, {pipeline_mode = #tpu.pipeline_mode<synchronous>, transform_indices = @transform_2, window_bounds = array<i64: 1, 256>}, {transform_indices = @transform_3, window_bounds = array<i64: 32, 256>}]} {
    %c0 = arith.constant 0 : index
    %c0_0 = arith.constant 0 : index
    %0 = vector.load %arg1[%c0, %c0_0] : memref<32x128xf32, #tpu.memory_space<vmem>>, vector<32x128xf32>
    %c0_1 = arith.constant 0 : index
    %c0_2 = arith.constant 0 : index
    %1 = vector.load %arg2[%c0_1, %c0_2] : memref<128x256xf32, #tpu.memory_space<vmem>>, vector<128x256xf32>
    %cst = arith.constant dense<0.000000e+00> : vector<32x256xf32>
    %2 = tpu.matmul %0, %1, %cst {dimension_numbers = #tpu.dot_dimension_numbers<[1], [0], [0], [1], [0, 0, 1, 1], [], []>} : vector<32x128xf32>, vector<128x256xf32>, vector<32x256xf32> -> vector<32x256xf32>
    %c0_3 = arith.constant 0 : index
    %c0_4 = arith.constant 0 : index
    %3 = vector.load %arg3[%c0_3, %c0_4] : memref<1x256xf32, #tpu.memory_space<vmem>>, vector<1x256xf32>
    %4 = vector.broadcast %3 : vector<1x256xf32> to vector<32x256xf32>
    %5 = arith.addf %2, %4 : vector<32x256xf32>
    %cst_5 = arith.constant 0.00999999977 : f32
    %6 = vector.broadcast %cst_5 : f32 to vector<32x256xf32>
    %7 = arith.mulf %6, %5 : vector<32x256xf32>
    %8 = arith.maximumf %5, %7 : vector<32x256xf32>
    %c0_6 = arith.constant 0 : index
    %c0_7 = arith.constant 0 : index
    %9 = vector.load %arg4[%c0_6, %c0_7] : memref<32x256xf32, #tpu.memory_space<vmem>>, vector<32x256xf32>
    tpu.vector_store %arg4[%c0_6, %c0_7], %8 {strides = array<i32>} : memref<32x256xf32, #tpu.memory_space<vmem>>, vector<32x256xf32>,
    return
  }
  func.func @transform_0(%arg0: i32) -> (i32, i32) {
    %c0_i32 = arith.constant 0 : i32
    %c0_i32_0 = arith.constant 0 : i32
    return %arg0, %c0_i32 : i32, i32
  }
  func.func @transform_1(%arg0: i32) -> (i32, i32) {
    %c0_i32 = arith.constant 0 : i32
    %c0_i32_0 = arith.constant 0 : i32
    %c0_i32_1 = arith.constant 0 : i32
    return %c0_i32, %c0_i32_0 : i32, i32
  }
  func.func @transform_2(%arg0: i32) -> (i32, i32) {
    %c0_i32 = arith.constant 0 : i32
    %c0_i32_0 = arith.constant 0 : i32
    %c0_i32_1 = arith.constant 0 : i32
    return %c0_i32, %c0_i32_0 : i32, i32
  }
  func.func @transform_3(%arg0: i32) -> (i32, i32) {
    %c0_i32 = arith.constant 0 : i32
    %c0_i32_0 = arith.constant 0 : i32
    return %arg0, %c0_i32 : i32, i32
  }
}

</mosaic_0001>

<bundles_post_ra>
// kernel: tpu_custom_call.1
= control target key start
LH: loop header
LB: loop body
LE: loop exit
PB: predicated region body
PF: predicated region fallthrough
CT: control target
= control target key end

     0   :  { %8 = vsyncpa [#allocation3], 0  ;;  %s378_s0 = inlined_call_operand.hbm [shape: f32[32,128], index: 0, kind: input, shape index: {}]   ;;  %s379_s1 = inlined_call_operand.hbm [shape: f32[128,256], index: 1, kind: input, shape index: {}]   ;;  %s380_s2 = inlined_call_operand.vmem [shape: f32[1,256], index: 2, kind: input, shape index: {}]   ;;  %s381_s3 = inlined_call_operand.hbm [shape: f32[32,256], index: 3, kind: output, shape index: {}]  }
   0x1   :  { %9 = vsyncpa [#allocation6], 0 }
   0x2   :  { %10 = vsyncpa [#allocation4], 0  ;;  %s328_s12 = smov [#allocation2]  }
   0x3   :  { %s16_s13 = sshll.u32 %s328_s12, 4  ;;  %s17_s13 = int_to_ptr.vmem [resolvable:$true] %s16_s13 }
   0x4   :  { %s270_s14 = scalar_lea.vmem %s17_s13, 512  ;;  %p275_p1 = scmp.lt.s32.totalorder %s17_s13, %s17_s13 }
   0x5   :  { %p271_p0 = scmp.ne.s32.totalorder %s17_s13, %s270_s14  ;;  %p276_p2 = scmp.lt.s32.totalorder %s270_s14, %s270_s14 }
   0x7   :  { %p277_p3 = por %p276_p2, %p275_p1 }
   0x9   :  { %p278_p4 = pnand %p277_p3, %p271_p0 }
   0xb   :  { %281 = shalt.err (!%p278_p4)
}
   0xc   :  { %s329_s15 = smov 128   ;;  %s330_s16 = smov 8  }
   0xd   :  { %22 = dma.hbm_to_vmem [thread:$0]  %s378_s0, 512, %s17_s13, [#allocation3], %s329_s15, %s329_s15, %s330_s16  }
   0xe   :  { %s331_s19 = smov [#allocation5]  }
   0xf   :  { %s28_s20 = sshll.u32 %s331_s19, 4  ;;  %s29_s20 = int_to_ptr.vmem [resolvable:$true] %s28_s20 }
  0x10   :  { %s290_s21 = scalar_lea.vmem %s29_s20, 4096  ;;  %p295_p6 = scmp.lt.s32.totalorder %s29_s20, %s29_s20 }
  0x11   :  { %p291_p5 = scmp.ne.s32.totalorder %s29_s20, %s290_s21  ;;  %p296_p7 = scmp.lt.s32.totalorder %s290_s21, %s290_s21 }
  0x13   :  { %p297_p8 = por %p296_p7, %p295_p6 }
  0x15   :  { %p298_p9 = pnand %p297_p8, %p291_p5 }
  0x17   :  { %301 = shalt.err (!%p298_p9)
}
  0x18   :  { %s332_s22 = smov 256   ;;  %s333_s23 = smov 16  }
  0x19   :  { %34 = dma.hbm_to_vmem [thread:$0]  %s379_s1, 4096, %s29_s20, [#allocation6], %s332_s22, %s332_s22, %s333_s23  }
  0x1a   :  { %322 = dma.done.wait [#allocation3], 512  }
  0x1b   :  { %323 = vsyncadd [#allocation3], 4294966784 }
  0x1c   :  { %324 = dma.done.wait [#allocation6], 4096  }
  0x1d   :  { %325 = vsyncadd [#allocation6], 4294963200  ;;  %v334_v0 = vmov 0.0   ;;  %v78_v1 = vld [vmem:[#allocation5 + $0xf8] sm:$0xff]  ;;  %v77_v2 = vld [vmem:[#allocation5 + $0xf0] sm:$0xff]  ;;  %v81_v37 = vlaneseq }
  0x1e   :  { %155 = vmatprep.mubr.f32.mxu0 %v334_v0  ;;  %167 = vmatprep.mubr.f32.mxu1 %v334_v0  ;;  %v76_v3 = vld [vmem:[#allocation5 + $0xe8] sm:$0xff]  ;;  %v75_v4 = vld [vmem:[#allocation5 + $0xe0] sm:$0xff]  ;;  %v74_v5 = vld [vmem:[#allocation5 + $0xd8] sm:$0xff] }
  0x1f   :  { %91 = vmatprep.subr.mxu0 %v78_v1  ;;  %222 = vmatprep.subr.mxu1 %v78_v1  ;;  %v73_v6 = vld [vmem:[#allocation5 + $0xd0] sm:$0xff]  ;;  %v72_v7 = vld [vmem:[#allocation5 + $0xc8] sm:$0xff]  ;;  %v71_v8 = vld [vmem:[#allocation5 + $0xc0] sm:$0xff]  ;;  %v82_v38 = vshrl.u32 %v81_v37, 7 }
  0x20   :  { %92 = vmatpush1.msra.mxu0 %v77_v2  ;;  %238 = vmatpush1.msra.mxu1 %v77_v2  ;;  %v70_v9 = vld [vmem:[#allocation5 + $0xb8] sm:$0xff]  ;;  %v69_v10 = vld [vmem:[#allocation5 + $0xb0] sm:$0xff]  ;;  %v68_v11 = vld [vmem:[#allocation5 + $0xa8] sm:$0xff] }
  0x21   :  { %93 = vmatprep.subr.mxu0 %v76_v3  ;;  %223 = vmatprep.subr.mxu1 %v76_v3  ;;  %v67_v12 = vld [vmem:[#allocation5 + $0xa0] sm:$0xff]  ;;  %v66_v13 = vld [vmem:[#allocation5 + $0x98] sm:$0xff]  ;;  %v65_v14 = vld [vmem:[#allocation5 + $0x90] sm:$0xff]  ;;  %v83_v39 = vsub.s32 0, %v82_v38  ;;  %v87_v41 = vsub.s32 1, %v82_v38 }
  0x22   :  { %94 = vmatpush1.msra.mxu0 %v75_v4  ;;  %239 = vmatpush1.msra.mxu1 %v75_v4  ;;  %v64_v15 = vld [vmem:[#allocation5 + $0x88] sm:$0xff]  ;;  %v63_v16 = vld [vmem:[#allocation5 + $0x80] sm:$0xff]  ;;  %v62_v17 = vld [vmem:[#allocation5 + $0x78] sm:$0xff] }
  0x23   :  { %95 = vmatprep.subr.mxu0 %v74_v5  ;;  %224 = vmatprep.subr.mxu1 %v74_v5  ;;  %v61_v18 = vld [vmem:[#allocation5 + $0x70] sm:$0xff]  ;;  %v60_v19 = vld [vmem:[#allocation5 + $0x68] sm:$0xff]  ;;  %v59_v20 = vld [vmem:[#allocation5 + $0x60] sm:$0xff] }
  0x24   :  { %96 = vmatpush1.msra.mxu0 %v73_v6  ;;  %240 = vmatpush1.msra.mxu1 %v73_v6  ;;  %v58_v21 = vld [vmem:[#allocation5 + $0x58] sm:$0xff]  ;;  %v57_v22 = vld [vmem:[#allocation5 + $0x50] sm:$0xff]  ;;  %v56_v23 = vld [vmem:[#allocation5 + $0x48] sm:$0xff] }
  0x25   :  { %97 = vmatprep.subr.mxu0 %v72_v7  ;;  %225 = vmatprep.subr.mxu1 %v72_v7  ;;  %v55_v24 = vld [vmem:[#allocation5 + $0x40] sm:$0xff]  ;;  %v54_v25 = vld [vmem:[#allocation5 + $0x38] sm:$0xff]  ;;  %v53_v26 = vld [vmem:[#allocation5 + $0x30] sm:$0xff] }
  0x26   :  { %98 = vmatpush1.msra.mxu0 %v71_v8  ;;  %241 = vmatpush1.msra.mxu1 %v71_v8  ;;  %v52_v27 = vld [vmem:[#allocation5 + $0x28] sm:$0xff]  ;;  %v51_v28 = vld [vmem:[#allocation5 + $0x20] sm:$0xff]  ;;  %v50_v29 = vld [vmem:[#allocation5 + $0x18] sm:$0xff] }
  0x27   :  { %99 = vmatprep.subr.mxu0 %v70_v9  ;;  %226 = vmatprep.subr.mxu1 %v70_v9  ;;  %v49_v30 = vld [vmem:[#allocation5 + $0x10] sm:$0xff]  ;;  %v48_v31 = vld [vmem:[#allocation5 + $0x8] sm:$0xff]  ;;  %v47_v32 = vld [vmem:[#allocation5] sm:$0xff] }
  0x28   :  { %100 = vmatpush1.msra.mxu0 %v69_v10  ;;  %242 = vmatpush1.msra.mxu1 %v69_v10  ;;  %v43_v33 = vld [vmem:[#allocation2] sm:$0xff]  ;;  %v45_v34 = vld [vmem:[#allocation2 + $0x10] sm:$0xff]  ;;  %v44_v35 = vld [vmem:[#allocation2 + $0x8] sm:$0xff] }
  0x29   :  { %101 = vmatprep.subr.mxu0 %v68_v11  ;;  %227 = vmatprep.subr.mxu1 %v68_v11  ;;  %v46_v36 = vld [vmem:[#allocation2 + $0x18] sm:$0xff]  ;;  %v79_v40 = vld [vmem:[%s380_s2] sm:$0x3]  ;;  %s335_s2 = smov [#allocation7]  }
  0x2a   :  { %102 = vmatpush1.msra.mxu0 %v67_v12  ;;  %243 = vmatpush1.msra.mxu1 %v67_v12  ;;  %v84_v42 = vrot.slane %v79_v40, %v83_v39  ;;  %v88_v43 = vrot.slane %v79_v40, %v87_v41  ;;  %s209_s26 = sshll.u32 %s335_s2, 4  ;;  %s210_s26 = int_to_ptr.vmem [resolvable:$true] %s209_s26 }
  0x2b   :  { %103 = vmatprep.subr.mxu0 %v66_v13  ;;  %228 = vmatprep.subr.mxu1 %v66_v13  ;;  %s302_s27 = scalar_lea.vmem %s210_s26, 1024  ;;  %p307_p11 = scmp.lt.s32.totalorder %s210_s26, %s210_s26 }
  0x2c   :  { %104 = vmatpush1.msra.mxu0 %v65_v14  ;;  %244 = vmatpush1.msra.mxu1 %v65_v14  ;;  %p303_p10 = scmp.ne.s32.totalorder %s210_s26, %s302_s27  ;;  %p308_p12 = scmp.lt.s32.totalorder %s302_s27, %s302_s27 }
  0x2d   :  { %105 = vmatprep.subr.mxu0 %v64_v15  ;;  %229 = vmatprep.subr.mxu1 %v64_v15 }
  0x2e   :  { %106 = vmatpush1.msra.mxu0 %v63_v16  ;;  %245 = vmatpush1.msra.mxu1 %v63_v16  ;;  %p309_p13 = por %p308_p12, %p307_p11 }
  0x2f   :  { %107 = vmatprep.subr.mxu0 %v62_v17  ;;  %230 = vmatprep.subr.mxu1 %v62_v17 }
  0x30   :  { %108 = vmatpush1.msra.mxu0 %v61_v18  ;;  %246 = vmatpush1.msra.mxu1 %v61_v18  ;;  %p310_p0 = pnand %p309_p13, %p303_p10 }
  0x31   :  { %109 = vmatprep.subr.mxu0 %v60_v19  ;;  %231 = vmatprep.subr.mxu1 %v60_v19 }
  0x32   :  { %110 = vmatpush1.msra.mxu0 %v59_v20  ;;  %247 = vmatpush1.msra.mxu1 %v59_v20 }
  0x33   :  { %111 = vmatprep.subr.mxu0 %v58_v21  ;;  %232 = vmatprep.subr.mxu1 %v58_v21 }
  0x34   :  { %112 = vmatpush1.msra.mxu0 %v57_v22  ;;  %248 = vmatpush1.msra.mxu1 %v57_v22 }
  0x35   :  { %113 = vmatprep.subr.mxu0 %v56_v23  ;;  %233 = vmatprep.subr.mxu1 %v56_v23 }
  0x36   :  { %114 = vmatpush1.msra.mxu0 %v55_v24  ;;  %249 = vmatpush1.msra.mxu1 %v55_v24 }
  0x37   :  { %115 = vmatprep.subr.mxu0 %v54_v25  ;;  %234 = vmatprep.subr.mxu1 %v54_v25 }
  0x38   :  { %116 = vmatpush1.msra.mxu0 %v53_v26  ;;  %250 = vmatpush1.msra.mxu1 %v53_v26 }
  0x39   :  { %117 = vmatprep.subr.mxu0 %v52_v27  ;;  %235 = vmatprep.subr.mxu1 %v52_v27 }
  0x3a   :  { %118 = vmatpush1.msra.mxu0 %v51_v28  ;;  %251 = vmatpush1.msra.mxu1 %v51_v28 }
  0x3b   :  { %119 = vmatprep.subr.mxu0 %v50_v29  ;;  %236 = vmatprep.subr.mxu1 %v50_v29 }
  0x3c   :  { %120 = vmatpush1.msra.mxu0 %v49_v30  ;;  %252 = vmatpush1.msra.mxu1 %v49_v30 }
  0x3d   :  { %121 = vmatprep.subr.mxu0 %v48_v31  ;;  %237 = vmatprep.subr.mxu1 %v48_v31 }
  0x3e   :  { %122 = vmatpush1.msra.mxu0 %v47_v32  ;;  %253 = vmatpush1.msra.mxu1 %v47_v32 }
  0x3f   :  { %156 = vmatmul.mubr.f32.vlgmr.msra.gmra.mxu0 %v43_v33  ;;  %168 = vmatmul.mubr.f32.vlgmr.msra.gmra.mxu1 %v45_v34 }
  0x40   :  { %161 = vmatprep.mubr.f32.mxu0 %v334_v0  ;;  %173 = vmatprep.mubr.f32.mxu1 %v334_v0 }
  0x43   :  { %162 = vmatmul.mubr.f32.gmra.mxu0 %v44_v35  ;;  %174 = vmatmul.mubr.f32.gmra.mxu1 %v46_v36 }
  0xff   :  { %v157_v44 = vpop.f32.mrf.mxu0  ;;  %v169_v45 = vpop.f32.mrf.mxu1 }
 0x100   :  { %v158_v46 = vadd.f32 %v157_v44, %v84_v42  ;;  %v170_v47 = vadd.f32 %v169_v45, %v84_v42 }
 0x101   :  { %v159_v48 = vpop.f32.mrf.mxu0  ;;  %v171_v49 = vpop.f32.mrf.mxu1 }
 0x102   :  { %v180_v50 = vmul.f32 0.01, %v158_v46  ;;  %v184_v51 = vmul.f32 0.01, %v170_v47  ;;  %v160_v52 = vadd.f32 %v159_v48, %v88_v43  ;;  %v172_v53 = vadd.f32 %v171_v49, %v88_v43 }
 0x103   :  { %v163_v54 = vpop.f32.mrf.mxu0  ;;  %v175_v55 = vpop.f32.mrf.mxu1 }
 0x104   :  { %v188_v56 = vmax.f32 %v158_v46, %v180_v50  ;;  %v192_v57 = vmax.f32 %v170_v47, %v184_v51  ;;  %v181_v58 = vmul.f32 0.01, %v160_v52  ;;  %v185_v59 = vmul.f32 0.01, %v172_v53 }
 0x105   :  { %v164_v60 = vadd.f32 %v163_v54, %v84_v42  ;;  %v176_v61 = vadd.f32 %v175_v55, %v84_v42  ;;  %v165_v62 = vpop.f32.mrf.mxu0  ;;  %v177_v63 = vpop.f32.mrf.mxu1 }
 0x106   :  { %196 = vst [vmem:[#allocation7] sm:$0xff] %v188_v56  ;;  %200 = vst [vmem:[#allocation7 + $0x20] sm:$0xff] %v192_v57  ;;  %v189_v0 = vmax.f32 %v160_v52, %v181_v58  ;;  %v193_v1 = vmax.f32 %v172_v53, %v185_v59  ;;  %v166_v2 = vadd.f32 %v165_v62, %v88_v43 }
 0x107   :  { %v178_v3 = vadd.f32 %v177_v63, %v88_v43  ;;  %v182_v4 = vmul.f32 0.01, %v164_v60  ;;  %v186_v5 = vmul.f32 0.01, %v176_v61 }
 0x108   :  { %197 = vst [vmem:[#allocation7 + $0x8] sm:$0xff] %v189_v0  ;;  %201 = vst [vmem:[#allocation7 + $0x28] sm:$0xff] %v193_v1  ;;  %v183_v6 = vmul.f32 0.01, %v166_v2 }
 0x109   :  { %v187_v7 = vmul.f32 0.01, %v178_v3  ;;  %v190_v8 = vmax.f32 %v164_v60, %v182_v4  ;;  %v194_v9 = vmax.f32 %v176_v61, %v186_v5 }
 0x10a   :  { %v191_v10 = vmax.f32 %v166_v2, %v183_v6 }
 0x10b   :  { %v195_v11 = vmax.f32 %v178_v3, %v187_v7  ;;  %198 = vst [vmem:[#allocation7 + $0x10] sm:$0xff] %v190_v8  ;;  %202 = vst [vmem:[#allocation7 + $0x30] sm:$0xff] %v194_v9 }
 0x10c   :  { %199 = vst [vmem:[#allocation7 + $0x18] sm:$0xff] %v191_v10 }
 0x10d   :  { %203 = vst [vmem:[#allocation7 + $0x38] sm:$0xff] %v195_v11 }
 0x10e   :  { %313 = shalt.err (!%p310_p0)
}
 0x10f   :  { %215 = dma.vmem_to_hbm [thread:$0]  %s210_s26, 1024, %s381_s3, [#allocation4], %s332_s22, %s332_s22, %s333_s23  }
 0x110   :  { %326 = dma.done.wait [#allocation4], 1024  }
 0x111   :  { %327 = vsyncadd [#allocation4], 4294966272 }
 0x112   :  { %219 = vsyncpa [#allocation3], 1 }
 0x113   :  { %220 = vsyncpa [#allocation6], 1 }
 0x114   :  { %221 = vsyncpa [#allocation4], 1 }

</bundles_post_ra>
